<compile_context>
chip_gen: v6e
topology: v6e:2x2x1
jax: 0.10.0
libtpu: 0.0.40
codegen_flags: <defaults>
</compile_context>

<pallas_src>
import functools

import jax
import jax.numpy as jnp
from jax.experimental import pallas as pl
from jax.experimental.pallas import tpu as pltpu


def _round_up(x, m):
    return ((x + m - 1) // m) * m


def decoder_kernel_acc(x_ref, w_ref, b_ref, o_ref, acc_ref):
    """General K-tiled path: accumulate over grid axis 2."""
    k = pl.program_id(2)

    @pl.when(k == 0)
    def _init():
        acc_ref[...] = jnp.zeros_like(acc_ref)

    acc_ref[...] += jnp.dot(
        x_ref[...], w_ref[...], preferred_element_type=jnp.float32
    )

    @pl.when(k == pl.num_programs(2) - 1)
    def _epilogue():
        # Bias add + dtype cast exactly once, after the full K reduction.
        o_ref[...] = (acc_ref[...] + b_ref[...].astype(jnp.float32)).astype(
            o_ref.dtype
        )


def decoder_kernel_single_k(x_ref, w_ref, b_ref, o_ref):
    """Fast path when the whole K reduction fits in one tile (no scratch)."""
    acc = jnp.dot(x_ref[...], w_ref[...], preferred_element_type=jnp.float32)
    o_ref[...] = (acc + b_ref[...].astype(jnp.float32)).astype(o_ref.dtype)


@functools.partial(jax.jit, static_argnames=("tm", "tn", "tk"))
def decoder_forward(x, w, b, *, tm=256, tn=256, tk=512):
    """x: (B, H), w: (H, D), b: (1, D)  ->  (B, D) == x @ w + b."""
    B, H = x.shape
    H2, D = w.shape
    assert H == H2 and b.shape == (1, D)

    # Clamp tiles for small problems; keep sublane (8) / lane (128) alignment.
    tm = min(tm, _round_up(B, 8))
    tn = min(tn, _round_up(D, 128))
    tk = min(tk, _round_up(H, 128))

    Mp = _round_up(B, tm)
    Np = _round_up(D, tn)
    Kp = _round_up(H, tk)

    # Zero-pad so every block is full-sized and output lanes are dense.
    xp = jnp.pad(x, ((0, Mp - B), (0, Kp - H))) if (Mp, Kp) != (B, H) else x
    wp = jnp.pad(w, ((0, Kp - H), (0, Np - D))) if (Kp, Np) != (H, D) else w
    bp = jnp.pad(b, ((0, 0), (0, Np - D))) if Np != D else b

    grid_m, grid_n, grid_k = Mp // tm, Np // tn, Kp // tk
    itemsize = jnp.dtype(x.dtype).itemsize

    cost = pl.CostEstimate(
        flops=2 * Mp * Kp * Np,
        transcendentals=0,
        bytes_accessed=(
            Mp * Kp * itemsize * grid_n      # x streamed once per N tile
            + Kp * Np * itemsize * grid_m    # W streamed once per M tile
            + Np * itemsize                  # bias
            + Mp * Np * itemsize             # output
        ),
    )

    if grid_k == 1:
        # Scratch-free fast path: single matmul + bias per (i, j) tile.
        out_padded = pl.pallas_call(
            decoder_kernel_single_k,
            out_shape=jax.ShapeDtypeStruct((Mp, Np), x.dtype),
            grid=(grid_m, grid_n),
            in_specs=[
                pl.BlockSpec((tm, tk), lambda i, j: (i, 0)),   # x tile
                pl.BlockSpec((tk, tn), lambda i, j: (0, j)),   # W tile
                pl.BlockSpec((1, tn), lambda i, j: (0, j)),    # bias slice
            ],
            out_specs=pl.BlockSpec((tm, tn), lambda i, j: (i, j)),
            compiler_params=pltpu.CompilerParams(
                dimension_semantics=("parallel", "parallel"),
                vmem_limit_bytes=32 * 1024 * 1024,
            ),
            cost_estimate=cost,
        )(xp, wp, bp)
    else:
        out_padded = pl.pallas_call(
            decoder_kernel_acc,
            out_shape=jax.ShapeDtypeStruct((Mp, Np), x.dtype),
            grid=(grid_m, grid_n, grid_k),
            in_specs=[
                pl.BlockSpec((tm, tk), lambda i, j, k: (i, k)),   # x tile
                pl.BlockSpec((tk, tn), lambda i, j, k: (k, j)),   # W tile
                pl.BlockSpec((1, tn), lambda i, j, k: (0, j)),    # bias (j only)
            ],
            out_specs=pl.BlockSpec((tm, tn), lambda i, j, k: (i, j)),
            scratch_shapes=[pltpu.VMEM((tm, tn), jnp.float32)],   # f32 accumulator
            compiler_params=pltpu.CompilerParams(
                dimension_semantics=("parallel", "parallel", "arbitrary"),
                vmem_limit_bytes=32 * 1024 * 1024,
            ),
            cost_estimate=cost,
        )(xp, wp, bp)

    if (Mp, Np) != (B, D):
        out_padded = out_padded[:B, :D]
    return out_padded


if __name__ == "__main__":
    key = jax.random.PRNGKey(0)
    kx, kw, kb = jax.random.split(key, 3)

    batch, hidden, data_dim = 8, 32, 64

    x = jax.random.normal(kx, (batch, hidden), dtype=jnp.float32)
    # "Linear" parameters (torch stores weight as (D, H); we keep (H, D)).
    w = jax.random.normal(kw, (hidden, data_dim), dtype=jnp.float32) * 0.05
    b = jax.random.normal(kb, (1, data_dim), dtype=jnp.float32) * 0.01

    out = jax.block_until_ready(decoder_forward(x, w, b))

    # Reference: Decoder.forward(x) == to_data(to_feature(x)) == x @ W + b
    ref = x @ w + b
    assert out.shape == (batch, data_dim)
    assert jnp.allclose(out, ref, atol=1e-4, rtol=1e-4)

    # Exercise the K-tiled accumulator path too (grid_k > 1).
    kx2, kw2, kb2 = jax.random.split(jax.random.PRNGKey(1), 3)
    B2, H2d, D2 = 128, 512, 256
    x2 = jax.random.normal(kx2, (B2, H2d), dtype=jnp.float32)
    w2 = jax.random.normal(kw2, (H2d, D2), dtype=jnp.float32) * 0.02
    b2 = jax.random.normal(kb2, (1, D2), dtype=jnp.float32) * 0.01
    out2 = jax.block_until_ready(decoder_forward(x2, w2, b2, tk=128))
    assert jnp.allclose(out2, x2 @ w2 + b2, atol=1e-3, rtol=1e-3)

    print("KERNEL_OK")
</pallas_src>

<mosaic_0001>
module attributes {stable_mosaic.version = 11 : i64} {
  func.func @decoder_kernel_single_k(%arg0: i32, %arg1: i32, %arg2: memref<8x128xf32, #tpu.memory_space<vmem>>, %arg3: memref<128x128xf32, #tpu.memory_space<vmem>>, %arg4: memref<1x128xf32, #tpu.memory_space<vmem>>, %arg5: memref<8x128xf32, #tpu.memory_space<vmem>>) attributes {dimension_semantics = [#tpu.dimension_semantics<parallel>, #tpu.dimension_semantics<parallel>], iteration_bounds = array<i64: 1, 1>, scalar_prefetch = 0 : i64, scratch_operands = 0 : i64, tpu.core_type = #tpu.core_type<tc>, window_params = [{transform_indices = @transform_0, window_bounds = array<i64: 8, 128>}, {transform_indices = @transform_1, window_bounds = array<i64: 128, 128>}, {transform_indices = @transform_2, window_bounds = array<i64: 1, 128>}, {transform_indices = @transform_3, window_bounds = array<i64: 8, 128>}]} {
    %c0 = arith.constant 0 : index
    %c0_0 = arith.constant 0 : index
    %0 = vector.load %arg2[%c0, %c0_0] : memref<8x128xf32, #tpu.memory_space<vmem>>, vector<8x128xf32>
    %c0_1 = arith.constant 0 : index
    %c0_2 = arith.constant 0 : index
    %1 = vector.load %arg3[%c0_1, %c0_2] : memref<128x128xf32, #tpu.memory_space<vmem>>, vector<128x128xf32>
    %cst = arith.constant dense<0.000000e+00> : vector<8x128xf32>
    %2 = tpu.matmul %0, %1, %cst {dimension_numbers = #tpu.dot_dimension_numbers<[1], [0], [0], [1], [0, 0, 1, 1], [], []>} : vector<8x128xf32>, vector<128x128xf32>, vector<8x128xf32> -> vector<8x128xf32>
    %c0_3 = arith.constant 0 : index
    %c0_4 = arith.constant 0 : index
    %3 = vector.load %arg4[%c0_3, %c0_4] : memref<1x128xf32, #tpu.memory_space<vmem>>, vector<1x128xf32>
    %4 = vector.broadcast %3 : vector<1x128xf32> to vector<8x128xf32>
    %5 = arith.addf %2, %4 : vector<8x128xf32>
    %c0_5 = arith.constant 0 : index
    %c0_6 = arith.constant 0 : index
    %6 = vector.load %arg5[%c0_5, %c0_6] : memref<8x128xf32, #tpu.memory_space<vmem>>, vector<8x128xf32>
    tpu.vector_store %arg5[%c0_5, %c0_6], %5 {strides = array<i32>} : memref<8x128xf32, #tpu.memory_space<vmem>>, vector<8x128xf32>,
    return
  }
  func.func @transform_0(%arg0: i32, %arg1: i32) -> (i32, i32) {
    %c0_i32 = arith.constant 0 : i32
    %c0_i32_0 = arith.constant 0 : i32
    return %arg0, %c0_i32 : i32, i32
  }
  func.func @transform_1(%arg0: i32, %arg1: i32) -> (i32, i32) {
    %c0_i32 = arith.constant 0 : i32
    %c0_i32_0 = arith.constant 0 : i32
    return %c0_i32, %arg1 : i32, i32
  }
  func.func @transform_2(%arg0: i32, %arg1: i32) -> (i32, i32) {
    %c0_i32 = arith.constant 0 : i32
    %c0_i32_0 = arith.constant 0 : i32
    return %c0_i32, %arg1 : i32, i32
  }
  func.func @transform_3(%arg0: i32, %arg1: i32) -> (i32, i32) {
    %c0_i32 = arith.constant 0 : i32
    return %arg0, %arg1 : i32, i32
  }
}

</mosaic_0001>

<bundles_post_ra>
// kernel: decoder_forward.1
= control target key start
LH: loop header
LB: loop body
LE: loop exit
PB: predicated region body
PF: predicated region fallthrough
CT: control target
= control target key end

     0   :  { %v202_v1 = vmov 0.0   ;;  %vm203_vm0 = vmmov 0   ;;  %s282_s0 = inlined_call_operand.vmem [shape: f32[8,128], index: 0, kind: input, shape index: {}]   ;;  %s283_s1 = inlined_call_operand.vmem [shape: f32[128,128], index: 1, kind: input, shape index: {}]   ;;  %s284_s2 = inlined_call_operand.vmem [shape: f32[1,128], index: 2, kind: input, shape index: {}]   ;;  %s285_s3 = inlined_call_operand.hbm [shape: f32[8,128], index: 3, kind: output, shape index: {}]  }
   0x1   :  { %v31_v0 = vld [vmem:[%s283_s1 + $0x78] sm:$0xff]  ;;  %142 = vmatprep.subr.mxu0 %v202_v1  ;;  %v30_v2 = vld [vmem:[%s283_s1 + $0x70] sm:$0xff]  ;;  %174 = vmatprep.mubr.msk.f32.mxu0 %vm203_vm0, %v202_v1  ;;  %v29_v3 = vld [vmem:[%s283_s1 + $0x68] sm:$0xff] }
   0x2   :  { %143 = vmatpush3.msra.mxu0 %v31_v0  ;;  %v28_v4 = vld [vmem:[%s283_s1 + $0x60] sm:$0xff] }
   0x3   :  { %144 = vmatprep.subr.mxu0 %v202_v1 }
   0x4   :  { %145 = vmatpush3.msra.mxu0 %v30_v2 }
   0x5   :  { %146 = vmatprep.subr.mxu0 %v202_v1 }
   0x6   :  { %147 = vmatpush3.msra.mxu0 %v29_v3 }
   0x7   :  { %8 = vsyncpa [#allocation3], 0  ;;  %148 = vmatprep.subr.mxu0 %v202_v1  ;;  %v27_v5 = vld [vmem:[%s283_s1 + $0x58] sm:$0xff]  ;;  %v26_v6 = vld [vmem:[%s283_s1 + $0x50] sm:$0xff]  ;;  %s204_s21 = smov [#allocation2]  }
   0x8   :  { %149 = vmatpush3.msra.mxu0 %v28_v4  ;;  %v25_v7 = vld [vmem:[%s283_s1 + $0x48] sm:$0xff]  ;;  %v24_v8 = vld [vmem:[%s283_s1 + $0x40] sm:$0xff]  ;;  %v23_v9 = vld [vmem:[%s283_s1 + $0x38] sm:$0xff]  ;;  %s116_s22 = sshll.u32 %s204_s21, 4  ;;  %s117_s22 = int_to_ptr.vmem [resolvable:$true] %s116_s22 }
   0x9   :  { %150 = vmatprep.subr.mxu0 %v202_v1  ;;  %v22_v10 = vld [vmem:[%s283_s1 + $0x30] sm:$0xff]  ;;  %v21_v11 = vld [vmem:[%s283_s1 + $0x28] sm:$0xff]  ;;  %v20_v12 = vld [vmem:[%s283_s1 + $0x20] sm:$0xff]  ;;  %p185_p1 = scmp.lt.s32.totalorder %s117_s22, %s117_s22 }
   0xa   :  { %151 = vmatpush3.msra.mxu0 %v27_v5  ;;  %v19_v13 = vld [vmem:[%s283_s1 + $0x18] sm:$0xff]  ;;  %v18_v14 = vld [vmem:[%s283_s1 + $0x10] sm:$0xff]  ;;  %v17_v15 = vld [vmem:[%s283_s1 + $0x8] sm:$0xff] }
   0xb   :  { %152 = vmatprep.subr.mxu0 %v202_v1  ;;  %v16_v16 = vld [vmem:[%s283_s1] sm:$0xff]  ;;  %s180_s1 = scalar_lea.vmem %s117_s22, 128 }
   0xc   :  { %153 = vmatpush3.msra.mxu0 %v26_v6  ;;  %v15_v17 = vld [vmem:[%s282_s0] sm:$0xff]  ;;  %p181_p0 = scmp.ne.s32.totalorder %s117_s22, %s180_s1  ;;  %p186_p2 = scmp.lt.s32.totalorder %s180_s1, %s180_s1 }
   0xd   :  { %154 = vmatprep.subr.mxu0 %v202_v1  ;;  %v124_v18 = vld [vmem:[%s284_s2] ss:$0 sm:$0xff] }
   0xe   :  { %155 = vmatpush3.msra.mxu0 %v25_v7  ;;  %p187_p3 = por %p186_p2, %p185_p1 }
   0xf   :  { %156 = vmatprep.subr.mxu0 %v202_v1 }
  0x10   :  { %157 = vmatpush3.msra.mxu0 %v24_v8  ;;  %p188_p4 = pnand %p187_p3, %p181_p0 }
  0x11   :  { %158 = vmatprep.subr.mxu0 %v202_v1 }
  0x12   :  { %159 = vmatpush3.msra.mxu0 %v23_v9 }
  0x13   :  { %160 = vmatprep.subr.mxu0 %v202_v1 }
  0x14   :  { %161 = vmatpush3.msra.mxu0 %v22_v10 }
  0x15   :  { %162 = vmatprep.subr.mxu0 %v202_v1 }
  0x16   :  { %163 = vmatpush3.msra.mxu0 %v21_v11 }
  0x17   :  { %164 = vmatprep.subr.mxu0 %v202_v1 }
  0x18   :  { %165 = vmatpush3.msra.mxu0 %v20_v12 }
  0x19   :  { %166 = vmatprep.subr.mxu0 %v202_v1 }
  0x1a   :  { %167 = vmatpush3.msra.mxu0 %v19_v13 }
  0x1b   :  { %168 = vmatprep.subr.mxu0 %v202_v1 }
  0x1c   :  { %169 = vmatpush3.msra.mxu0 %v18_v14 }
  0x1d   :  { %170 = vmatprep.subr.mxu0 %v202_v1 }
  0x1e   :  { %171 = vmatpush3.msra.mxu0 %v17_v15 }
  0x1f   :  { %172 = vmatprep.subr.mxu0 %v202_v1 }
  0x20   :  { %173 = vmatpush3.msra.mxu0 %v16_v16 }
  0x21   :  { %175 = vmatmul.mubr.f32.vlgmr.msra.gmra.mxu0 %v15_v17 }
  0xe1   :  { %v105_v19 = vpop.f32.mrf.mxu0 }
  0xe2   :  { %v106_v20 = vadd.f32 %v124_v18, %v105_v19 }
  0xe3   :  { %v176_v21 = vpop.f32.mrf.mxu0 }
  0xe4   :  { %109 = vst [vmem:[#allocation2] sm:$0xff] %v106_v20 }
  0xe5   :  { %191 = shalt.err (!%p188_p4)
}
  0xe6   :  { %119 = dma.vmem_to_hbm [thread:$0]  %s117_s22, 128, %s285_s3, [#allocation3]  }
  0xe7   :  { %200 = dma.done.wait [#allocation3], 128  }
  0xe8   :  { %201 = vsyncadd [#allocation3], 4294967168 }
  0xe9   :  { %123 = vsyncpa [#allocation3], 1 }

</bundles_post_ra>
